<compile_context>
chip_gen: v7x
topology: tpu7x:2x2x1
jax: 0.10.0
libtpu: 0.0.40
codegen_flags: <defaults>
</compile_context>

<pallas_src>
import functools

import jax
import jax.numpy as jnp
from jax.experimental import pallas as pl
from jax.experimental.pallas import tpu as pltpu

_HIDDEN = (50, 100, 50)

_TM_CAP = 1024   # batch rows per grid step (256 was overhead-bound per review)
_SUBLANE = 16    # second-minor granularity legal for both f32 and bf16 blocks


def _round_up(x, m):
    return ((x + m - 1) // m) * m


def _choose_batch_tiling(batch):
    """Pick (tile_rows, padded_batch).

    Large tiles amortize the ~0.35 us per-grid-step cost; the tile count is
    derived from the batch so over-padding is at most a few sublanes, and for
    mid-size batches we force >= 2 grid steps so the "parallel" batch axis can
    use both v7x TensorCores (no effect on single-TC v5e/v6e).
    """
    b = _round_up(max(batch, _SUBLANE), _SUBLANE)
    n = pl.cdiv(b, _TM_CAP)
    if n == 1 and b >= 2 * _SUBLANE:
        n = 2
    tm = _round_up(pl.cdiv(b, n), _SUBLANE)
    return tm, n * tm


def _mlp_kernel(x_ref, w1_ref, w_ref, b_ref, o_ref):
    # x_ref:  (TM, in_f)   compute dtype (bf16 or f32)
    # w1_ref: (in_f, D)    fc1 weight, transposed to (in, out), lane-padded
    # w_ref:  (3, D, D)    fc2..fc4 weights, transposed + zero-padded
    # b_ref:  (4, 1, D)    biases, f32, zero-padded
    # o_ref:  (TM, D)      f32, lane-dense output
    h = jnp.dot(x_ref[...], w1_ref[...],
                preferred_element_type=jnp.float32) + b_ref[0]
    h = jnp.maximum(h, 0.0)
    for layer in range(3):
        h = jnp.dot(h.astype(w_ref.dtype), w_ref[layer],
                    preferred_element_type=jnp.float32) + b_ref[layer + 1]
        if layer < 2:
            h = jnp.maximum(h, 0.0)
    o_ref[...] = h.astype(o_ref.dtype)


def pack_params(params, input_size, output_size, compute_dtype=jnp.bfloat16):
    """Pack PyTorch-layout params into TPU-friendly resident buffers (once).

    Returns:
      w1:     (input_size, D)  fc1 weight, transposed to (in, out), zero-padded
      w_slab: (3, D, D)        fc2..fc4 weights, transposed, zero-padded
      b_slab: (4, 1, D)        all biases, f32, zero-padded
    with D = 128 * ceil(max(50, 100, 50, output_size) / 128).
    Zero padding keeps padded lanes exactly zero through the network.
    """
    D = _round_up(max(_HIDDEN + (output_size,)), 128)

    w1 = jnp.zeros((input_size, D), compute_dtype)
    w1 = w1.at[:, :_HIDDEN[0]].set(
        jnp.asarray(params["w1"]).T.astype(compute_dtype))

    w_slab = jnp.zeros((3, D, D), compute_dtype)
    b_slab = jnp.zeros((4, 1, D), jnp.float32)
    b_slab = b_slab.at[0, 0, :_HIDDEN[0]].set(
        jnp.asarray(params["b1"]).astype(jnp.float32))
    for i in (2, 3, 4):
        w = jnp.asarray(params[f"w{i}"]).T.astype(compute_dtype)   # (in, out)
        b = jnp.asarray(params[f"b{i}"]).astype(jnp.float32)
        in_f, out_f = w.shape
        w_slab = w_slab.at[i - 2, :in_f, :out_f].set(w)
        b_slab = b_slab.at[i - 1, 0, :out_f].set(b)
    return w1, w_slab, b_slab


@functools.partial(jax.jit, static_argnames=("output_size",))
def nn_test_forward(x, w1, w_slab, b_slab, output_size):
    """Fused 4-layer MLP forward as a single batch-gridded Pallas TPU kernel.

    x: (batch, input_size) float32
    w1 / w_slab / b_slab: packed buffers from pack_params.
    """
    batch, in_f = x.shape
    D = w_slab.shape[-1]
    cdtype = w_slab.dtype

    tm, batch_pad = _choose_batch_tiling(batch)
    grid = batch_pad // tm

    # Cast once to the compute dtype; pad only the batch (row) axis, and only
    # when needed.  No feature-dim padding: the kernel consumes the true in_f.
    x_c = x.astype(cdtype)
    if batch_pad != batch:
        x_c = jnp.pad(x_c, ((0, batch_pad - batch), (0, 0)))

    cost = pl.CostEstimate(
        flops=2 * batch_pad * (in_f * D + 3 * D * D),
        transcendentals=0,
        bytes_accessed=(batch_pad * in_f * x_c.dtype.itemsize       # x in
                        + batch_pad * D * 4                          # out
                        + w1.size * w1.dtype.itemsize
                        + w_slab.size * w_slab.dtype.itemsize
                        + b_slab.size * b_slab.dtype.itemsize),
    )

    out_pad = pl.pallas_call(
        _mlp_kernel,
        out_shape=jax.ShapeDtypeStruct((batch_pad, D), jnp.float32),
        grid_spec=pltpu.PrefetchScalarGridSpec(
            num_scalar_prefetch=0,
            grid=(grid,),
            in_specs=[
                pl.BlockSpec((tm, in_f), lambda i: (i, 0)),      # x tile (true width)
                pl.BlockSpec((in_f, D), lambda i: (0, 0)),       # resident fc1 weight
                pl.BlockSpec((3, D, D), lambda i: (0, 0, 0)),    # resident fc2-4 weights
                pl.BlockSpec((4, 1, D), lambda i: (0, 0, 0)),    # resident biases (f32)
            ],
            out_specs=pl.BlockSpec((tm, D), lambda i: (i, 0)),   # lane-dense output
        ),
        compiler_params=pltpu.CompilerParams(
            dimension_semantics=("parallel",),
        ),
        cost_estimate=cost,
    )(x_c, w1, w_slab, b_slab)

    return out_pad[:batch, :output_size]


def init_params(key, input_size, output_size):
    """PyTorch-style nn.Linear init: U(-1/sqrt(fan_in), 1/sqrt(fan_in)).

    Weights stored in PyTorch layout (out_features, in_features).
    """
    sizes = [(50, input_size), (100, 50), (50, 100), (output_size, 50)]
    params = {}
    for i, (out_f, in_f) in enumerate(sizes, start=1):
        key, kw, kb = jax.random.split(key, 3)
        bound = 1.0 / jnp.sqrt(in_f)
        params[f"w{i}"] = jax.random.uniform(
            kw, (out_f, in_f), jnp.float32, minval=-bound, maxval=bound)
        params[f"b{i}"] = jax.random.uniform(
            kb, (out_f,), jnp.float32, minval=-bound, maxval=bound)
    return params


def _reference_forward(x, params):
    """Pure-JAX f32 reference of the PyTorch forward."""
    h = x
    for i in (1, 2, 3):
        h = jnp.maximum(h @ params[f"w{i}"].T + params[f"b{i}"], 0.0)
    return h @ params["w4"].T + params["b4"]


def _reference_forward_matched(x, params, cdtype):
    """Reference mirroring the kernel's dtype handling:
    cdtype matmul operands, f32 accumulation, f32 bias/ReLU path."""
    h = x
    for i in (1, 2, 3, 4):
        w = params[f"w{i}"].T.astype(cdtype)
        h = jnp.dot(h.astype(cdtype), w,
                    preferred_element_type=jnp.float32) + params[f"b{i}"]
        if i != 4:
            h = jnp.maximum(h, 0.0)
    return h


if __name__ == "__main__":
    input_size = 32
    output_size = 10
    batch = 8

    key = jax.random.PRNGKey(0)
    key, kx = jax.random.split(key)
    x = jax.random.normal(kx, (batch, input_size), jnp.float32)
    params = init_params(key, input_size, output_size)

    # --- performance path: bf16 matmul operands, f32 accumulation (default) ---
    w1, w_slab, b_slab = pack_params(params, input_size, output_size)
    out = jax.block_until_ready(nn_test_forward(x, w1, w_slab, b_slab, output_size))
    assert out.shape == (batch, output_size)
    ref_bf16 = _reference_forward_matched(x, params, jnp.bfloat16)
    assert jnp.allclose(out, ref_bf16, atol=1e-4, rtol=1e-4), "bf16 path mismatch"

    # --- exact-semantics path: f32 operands, matches the PyTorch f32 forward ---
    w1f, w_slabf, b_slabf = pack_params(
        params, input_size, output_size, compute_dtype=jnp.float32)
    out_f32 = jax.block_until_ready(
        nn_test_forward(x, w1f, w_slabf, b_slabf, output_size))
    ref = _reference_forward(x, params)
    assert jnp.allclose(out_f32, ref, atol=1e-4, rtol=1e-4), "f32 path mismatch"

    print("KERNEL_OK")
</pallas_src>

<mosaic_0001>
module attributes {stable_mosaic.version = 11 : i64} {
  func.func @_mlp_kernel(%arg0: i32, %arg1: memref<16x32xbf16, #tpu.memory_space<vmem>>, %arg2: memref<32x128xbf16, #tpu.memory_space<vmem>>, %arg3: memref<3x128x128xbf16, #tpu.memory_space<vmem>>, %arg4: memref<4x1x128xf32, #tpu.memory_space<vmem>>, %arg5: memref<16x128xf32, #tpu.memory_space<vmem>>) attributes {dimension_semantics = [#tpu.dimension_semantics<parallel>], iteration_bounds = array<i64: 1>, scalar_prefetch = 0 : i64, scratch_operands = 0 : i64, tpu.core_type = #tpu.core_type<tc>, window_params = [{transform_indices = @transform_0, window_bounds = array<i64: 16, 32>}, {pipeline_mode = #tpu.pipeline_mode<synchronous>, transform_indices = @transform_1, window_bounds = array<i64: 32, 128>}, {pipeline_mode = #tpu.pipeline_mode<synchronous>, transform_indices = @transform_2, window_bounds = array<i64: 3, 128, 128>}, {pipeline_mode = #tpu.pipeline_mode<synchronous>, transform_indices = @transform_3, window_bounds = array<i64: 4, 1, 128>}, {transform_indices = @transform_4, window_bounds = array<i64: 16, 128>}]} {
    %c0 = arith.constant 0 : index
    %c0_0 = arith.constant 0 : index
    %0 = vector.load %arg1[%c0, %c0_0] : memref<16x32xbf16, #tpu.memory_space<vmem>>, vector<16x32xbf16>
    %c0_1 = arith.constant 0 : index
    %c0_2 = arith.constant 0 : index
    %1 = vector.load %arg2[%c0_1, %c0_2] : memref<32x128xbf16, #tpu.memory_space<vmem>>, vector<32x128xbf16>
    %cst = arith.constant dense<0.000000e+00> : vector<16x128xf32>
    %2 = tpu.matmul %0, %1, %cst {dimension_numbers = #tpu.dot_dimension_numbers<[1], [0], [0], [1], [0, 0, 1, 1], [], []>} : vector<16x32xbf16>, vector<32x128xbf16>, vector<16x128xf32> -> vector<16x128xf32>
    %c0_3 = arith.constant 0 : index
    %c0_4 = arith.constant 0 : index
    %c0_5 = arith.constant 0 : index
    %3 = vector.load %arg4[%c0_3, %c0_4, %c0_5] : memref<4x1x128xf32, #tpu.memory_space<vmem>>, vector<1x1x128xf32>
    %4 = vector.shape_cast %3 : vector<1x1x128xf32> to vector<1x128xf32>
    %5 = vector.broadcast %4 : vector<1x128xf32> to vector<16x128xf32>
    %6 = arith.addf %2, %5 : vector<16x128xf32>
    %cst_6 = arith.constant 0.000000e+00 : f32
    %7 = vector.broadcast %cst_6 : f32 to vector<16x128xf32>
    %8 = arith.maximumf %6, %7 : vector<16x128xf32>
    %9 = arith.truncf %8 : vector<16x128xf32> to vector<16x128xbf16>
    %c0_7 = arith.constant 0 : index
    %c0_8 = arith.constant 0 : index
    %c0_9 = arith.constant 0 : index
    %10 = vector.load %arg3[%c0_7, %c0_8, %c0_9] : memref<3x128x128xbf16, #tpu.memory_space<vmem>>, vector<1x128x128xbf16>
    %11 = vector.shape_cast %10 : vector<1x128x128xbf16> to vector<128x128xbf16>
    %cst_10 = arith.constant dense<0.000000e+00> : vector<16x128xf32>
    %12 = tpu.matmul %9, %11, %cst_10 {dimension_numbers = #tpu.dot_dimension_numbers<[1], [0], [0], [1], [0, 0, 1, 1], [], []>} : vector<16x128xbf16>, vector<128x128xbf16>, vector<16x128xf32> -> vector<16x128xf32>
    %c1 = arith.constant 1 : index
    %c0_11 = arith.constant 0 : index
    %c0_12 = arith.constant 0 : index
    %13 = vector.load %arg4[%c1, %c0_11, %c0_12] : memref<4x1x128xf32, #tpu.memory_space<vmem>>, vector<1x1x128xf32>
    %14 = vector.shape_cast %13 : vector<1x1x128xf32> to vector<1x128xf32>
    %15 = vector.broadcast %14 : vector<1x128xf32> to vector<16x128xf32>
    %16 = arith.addf %12, %15 : vector<16x128xf32>
    %cst_13 = arith.constant 0.000000e+00 : f32
    %17 = vector.broadcast %cst_13 : f32 to vector<16x128xf32>
    %18 = arith.maximumf %16, %17 : vector<16x128xf32>
    %19 = arith.truncf %18 : vector<16x128xf32> to vector<16x128xbf16>
    %c1_14 = arith.constant 1 : index
    %c0_15 = arith.constant 0 : index
    %c0_16 = arith.constant 0 : index
    %20 = vector.load %arg3[%c1_14, %c0_15, %c0_16] : memref<3x128x128xbf16, #tpu.memory_space<vmem>>, vector<1x128x128xbf16>
    %21 = vector.shape_cast %20 : vector<1x128x128xbf16> to vector<128x128xbf16>
    %cst_17 = arith.constant dense<0.000000e+00> : vector<16x128xf32>
    %22 = tpu.matmul %19, %21, %cst_17 {dimension_numbers = #tpu.dot_dimension_numbers<[1], [0], [0], [1], [0, 0, 1, 1], [], []>} : vector<16x128xbf16>, vector<128x128xbf16>, vector<16x128xf32> -> vector<16x128xf32>
    %c2 = arith.constant 2 : index
    %c0_18 = arith.constant 0 : index
    %c0_19 = arith.constant 0 : index
    %23 = vector.load %arg4[%c2, %c0_18, %c0_19] : memref<4x1x128xf32, #tpu.memory_space<vmem>>, vector<1x1x128xf32>
    %24 = vector.shape_cast %23 : vector<1x1x128xf32> to vector<1x128xf32>
    %25 = vector.broadcast %24 : vector<1x128xf32> to vector<16x128xf32>
    %26 = arith.addf %22, %25 : vector<16x128xf32>
    %cst_20 = arith.constant 0.000000e+00 : f32
    %27 = vector.broadcast %cst_20 : f32 to vector<16x128xf32>
    %28 = arith.maximumf %26, %27 : vector<16x128xf32>
    %29 = arith.truncf %28 : vector<16x128xf32> to vector<16x128xbf16>
    %c2_21 = arith.constant 2 : index
    %c0_22 = arith.constant 0 : index
    %c0_23 = arith.constant 0 : index
    %30 = vector.load %arg3[%c2_21, %c0_22, %c0_23] : memref<3x128x128xbf16, #tpu.memory_space<vmem>>, vector<1x128x128xbf16>
    %31 = vector.shape_cast %30 : vector<1x128x128xbf16> to vector<128x128xbf16>
    %cst_24 = arith.constant dense<0.000000e+00> : vector<16x128xf32>
    %32 = tpu.matmul %29, %31, %cst_24 {dimension_numbers = #tpu.dot_dimension_numbers<[1], [0], [0], [1], [0, 0, 1, 1], [], []>} : vector<16x128xbf16>, vector<128x128xbf16>, vector<16x128xf32> -> vector<16x128xf32>
    %c3 = arith.constant 3 : index
    %c0_25 = arith.constant 0 : index
    %c0_26 = arith.constant 0 : index
    %33 = vector.load %arg4[%c3, %c0_25, %c0_26] : memref<4x1x128xf32, #tpu.memory_space<vmem>>, vector<1x1x128xf32>
    %34 = vector.shape_cast %33 : vector<1x1x128xf32> to vector<1x128xf32>
    %35 = vector.broadcast %34 : vector<1x128xf32> to vector<16x128xf32>
    %36 = arith.addf %32, %35 : vector<16x128xf32>
    %c0_27 = arith.constant 0 : index
    %c0_28 = arith.constant 0 : index
    %37 = vector.load %arg5[%c0_27, %c0_28] : memref<16x128xf32, #tpu.memory_space<vmem>>, vector<16x128xf32>
    tpu.vector_store %arg5[%c0_27, %c0_28], %36 {strides = array<i32>} : memref<16x128xf32, #tpu.memory_space<vmem>>, vector<16x128xf32>,
    return
  }
  func.func @transform_0(%arg0: i32) -> (i32, i32) {
    %c0_i32 = arith.constant 0 : i32
    %c0_i32_0 = arith.constant 0 : i32
    return %arg0, %c0_i32 : i32, i32
  }
  func.func @transform_1(%arg0: i32) -> (i32, i32) {
    %c0_i32 = arith.constant 0 : i32
    %c0_i32_0 = arith.constant 0 : i32
    %c0_i32_1 = arith.constant 0 : i32
    return %c0_i32, %c0_i32_0 : i32, i32
  }
  func.func @transform_2(%arg0: i32) -> (i32, i32, i32) {
    %c0_i32 = arith.constant 0 : i32
    %c0_i32_0 = arith.constant 0 : i32
    %c0_i32_1 = arith.constant 0 : i32
    %c0_i32_2 = arith.constant 0 : i32
    return %c0_i32, %c0_i32_0, %c0_i32_1 : i32, i32, i32
  }
  func.func @transform_3(%arg0: i32) -> (i32, i32, i32) {
    %c0_i32 = arith.constant 0 : i32
    %c0_i32_0 = arith.constant 0 : i32
    %c0_i32_1 = arith.constant 0 : i32
    %c0_i32_2 = arith.constant 0 : i32
    return %c0_i32, %c0_i32_0, %c0_i32_1 : i32, i32, i32
  }
  func.func @transform_4(%arg0: i32) -> (i32, i32) {
    %c0_i32 = arith.constant 0 : i32
    %c0_i32_0 = arith.constant 0 : i32
    return %arg0, %c0_i32 : i32, i32
  }
}

</mosaic_0001>

<bundles_post_ra>
// kernel: nn_test_forward.1
= control target key start
LH: loop header
LB: loop body
LE: loop exit
PB: predicated region body
PF: predicated region fallthrough
CT: control target
= control target key end

     0   :  { %9 = vsyncpa [#allocation3], 0  ;;  %s653_s15 = smov [#allocation2]   ;;  %s756_s0 = inlined_call_operand.vmem [shape: bf16[16,32], index: 0, kind: input, shape index: {}]   ;;  %s757_s1 = inlined_call_operand.vmem [shape: bf16[32,128], index: 1, kind: input, shape index: {}]   ;;  %s758_s2 = inlined_call_operand.hbm [shape: bf16[3,128,128], index: 2, kind: input, shape index: {}]   ;;  %s759_s3 = inlined_call_operand.vmem [shape: f32[4,1,128], index: 3, kind: input, shape index: {}]   ;;  %s760_s4 = inlined_call_operand.vmem [shape: f32[16,128], index: 4, kind: output, shape index: {}]  }
   0x1   :  { %s19_s16 = sshll.u32 %s653_s15, 4  ;;  %s629_s19 = scalar_lea.hbm %s758_s2, 3072  ;;  %s20_s16 = int_to_ptr.vmem [resolvable:$true] %s19_s16 }
   0x2   :  { %p630_p0 = scmp.ne.s32.totalorder %s758_s2, %s629_s19  ;;  %p633_p1 = scmp.lt.u32.totalorder %s629_s19, %s758_s2 }
   0x4   :  { %p635_p2 = pnand %p633_p1, %p630_p0 }
   0x6   :  { %638 = shalt.err (!%p635_p2)
}
   0x7   :  { %s639_s24 = scalar_lea.vmem %s20_s16, 3072  ;;  %p644_p4 = scmp.lt.s32.totalorder %s20_s16, %s20_s16 }
   0x8   :  { %p640_p3 = scmp.ne.s32.totalorder %s20_s16, %s639_s24  ;;  %p645_p5 = scmp.lt.s32.totalorder %s639_s24, %s639_s24 }
   0xa   :  { %p646_p6 = por %p645_p5, %p644_p4 }
   0xc   :  { %p647_p7 = pnand %p646_p6, %p640_p3 }
   0xe   :  { %650 = shalt.err (!%p647_p7)
}
   0xf   :  { %s654_s25 = smov 64   ;;  %s655_s26 = smov 4  }
  0x10   :  { %25 = dma.hbm_to_vmem [thread:$0]  %s758_s2, 3072, %s20_s16, [#allocation3], %s654_s25, %s654_s25, %s655_s26  }
  0x11   :  { %651 = dma.done.wait [#allocation3], 3072  }
  0x12   :  { %652 = vsyncadd [#allocation3], 4294964224  ;;  %v656_v0 = vmov 0.0   ;;  %vm657_vm0 = vmmov 0   ;;  %v602_v1 = vld [vmem:[%s757_s1] sm:$0xff]   ;;  %v603_v2 = vld [vmem:[%s757_s1 + $0x8] sm:$0xff]  }
  0x13   :  { %529 = vmatprep.subr.bf16.mxu0 %v656_v0  ;;  %533 = vmatprep.mubr.msk.bf16.mxu0 %vm657_vm0, %v656_v0  ;;  %v605_v3 = vld [vmem:[#allocation2] sm:$0xff]   ;;  %v604_v4 = vld [vmem:[%s756_s0] sm:$0xff]   ;;  %v606_v5 = vld [vmem:[#allocation2 + $0x8] sm:$0xff]   ;;  %vm62_vm1 = vcmask 261120  }
  0x14   :  { %537 = vmatprep.subr.bf16.mxu1 %v656_v0  ;;  %553 = vmatprep.mubr.msk.bf16.mxu1 %vm657_vm0, %v656_v0  ;;  %v607_v6 = vld [vmem:[#allocation2 + $0x10] sm:$0xff]   ;;  %v608_v7 = vld [vmem:[#allocation2 + $0x18] sm:$0xff]   ;;  %v609_v8 = vld [vmem:[#allocation2 + $0x20] sm:$0xff]  }
  0x15   :  { %530 = vmatpush3.bf16.msra.mxu0 %v602_v1  ;;  %538 = vmatpush3.bf16.msra.mxu1 %v605_v3  ;;  %v610_v9 = vld [vmem:[#allocation2 + $0x28] sm:$0xff]   ;;  %v611_v10 = vld [vmem:[#allocation2 + $0x30] sm:$0xff]   ;;  %v612_v11 = vld [vmem:[#allocation2 + $0x38] sm:$0xff]  }
  0x16   :  { %531 = vmatprep.subr.bf16.mxu0 %v656_v0  ;;  %539 = vmatprep.subr.bf16.mxu1 %v656_v0  ;;  %v613_v12 = vld [vmem:[#allocation2 + $0x40] sm:$0xff]   ;;  %v614_v13 = vld [vmem:[#allocation2 + $0x48] sm:$0xff]   ;;  %v615_v14 = vld [vmem:[#allocation2 + $0x50] sm:$0xff]  }
  0x17   :  { %v616_v15 = vld [vmem:[#allocation2 + $0x58] sm:$0xff]   ;;  %v617_v16 = vld [vmem:[#allocation2 + $0x60] sm:$0xff]   ;;  %v618_v17 = vld [vmem:[#allocation2 + $0x68] sm:$0xff]  }
  0x18   :  { %v464_v18 = vld [vmem:[%s759_s3] ss:$0 sm:$0xff]  ;;  %v620_v29 = vld [vmem:[#allocation2 + $0x78] sm:$0xff]   ;;  %v621_v30 = vld [vmem:[#allocation2 + $0x80] sm:$0xff]  }
  0x19   :  { %532 = vmatpush3.bf16.msra.mxu0 %v603_v2  ;;  %540 = vmatpush3.bf16.msra.mxu1 %v606_v5  ;;  %v619_v28 = vld [vmem:[#allocation2 + $0x70] sm:$0xff]   ;;  %v622_v31 = vld [vmem:[#allocation2 + $0x88] sm:$0xff]   ;;  %v624_v33 = vld [vmem:[#allocation2 + $0x98] sm:$0xff]  }
  0x1a   :  { %557 = vmatprep.subr.bf16.mxu0 %v656_v0  ;;  %541 = vmatprep.subr.bf16.mxu1 %v656_v0  ;;  %v623_v32 = vld [vmem:[#allocation2 + $0x90] sm:$0xff]   ;;  %v625_v34 = vld [vmem:[#allocation2 + $0xa0] sm:$0xff]   ;;  %v626_v35 = vld [vmem:[#allocation2 + $0xa8] sm:$0xff]  }
  0x1b   :  { %v470_v36 = vld [vmem:[%s759_s3 + $0x1] ss:$0 sm:$0xff]  ;;  %v628_v47 = vld [vmem:[#allocation2 + $0xb8] sm:$0xff]   ;;  %v480_v48 = vld [vmem:[%s759_s3 + $0x2] ss:$0 sm:$0xff] }
  0x1c   :  { %534 = vmatmul.mubr.msk.bf16.vlgmr.msra.gmra.mrb[0].mxu0 %vm62_vm1, %v604_v4  ;;  %v627_v46 = vld [vmem:[#allocation2 + $0xb0] sm:$0xff]  }
  0x1d   :  { %573 = vmatprep.mubr.msk.bf16.mxu0 %vm657_vm0, %v656_v0  ;;  %542 = vmatpush3.bf16.msra.mxu1 %v607_v6  ;;  %v490_v58 = vld [vmem:[%s759_s3 + $0x3] ss:$0 sm:$0xff] }
  0x1e   :  { %543 = vmatprep.subr.bf16.mxu1 %v656_v0  ;;  %558 = vmatpush3.bf16.msra.mxu0 %v613_v12 }
  0x1f   :  { %559 = vmatprep.subr.bf16.mxu0 %v656_v0 }
  0x21   :  { %544 = vmatpush3.bf16.msra.mxu1 %v608_v7 }
  0x22   :  { %545 = vmatprep.subr.bf16.mxu1 %v656_v0  ;;  %560 = vmatpush3.bf16.msra.mxu0 %v614_v13 }
  0x23   :  { %561 = vmatprep.subr.bf16.mxu0 %v656_v0 }
  0x25   :  { %546 = vmatpush3.bf16.msra.mxu1 %v609_v8 }
  0x26   :  { %547 = vmatprep.subr.bf16.mxu1 %v656_v0  ;;  %562 = vmatpush3.bf16.msra.mxu0 %v615_v14 }
  0x27   :  { %563 = vmatprep.subr.bf16.mxu0 %v656_v0 }
  0x29   :  { %548 = vmatpush3.bf16.msra.mxu1 %v610_v9 }
  0x2a   :  { %549 = vmatprep.subr.bf16.mxu1 %v656_v0  ;;  %564 = vmatpush3.bf16.msra.mxu0 %v616_v15 }
  0x2b   :  { %565 = vmatprep.subr.bf16.mxu0 %v656_v0 }
  0x2d   :  { %550 = vmatpush3.bf16.msra.mxu1 %v611_v10 }
  0x2e   :  { %551 = vmatprep.subr.bf16.mxu1 %v656_v0  ;;  %566 = vmatpush3.bf16.msra.mxu0 %v617_v16 }
  0x2f   :  { %567 = vmatprep.subr.bf16.mxu0 %v656_v0 }
  0x31   :  { %552 = vmatpush3.bf16.msra.mxu1 %v612_v11 }
  0x32   :  { %577 = vmatprep.subr.bf16.mxu1 %v656_v0  ;;  %568 = vmatpush3.bf16.msra.mxu0 %v618_v17 }
  0x33   :  { %569 = vmatprep.subr.bf16.mxu0 %v656_v0 }
  0x36   :  { %570 = vmatpush3.bf16.msra.mxu0 %v619_v28 }
  0x37   :  { %571 = vmatprep.subr.bf16.mxu0 %v656_v0 }
  0x3a   :  { %572 = vmatpush3.bf16.msra.mxu0 %v620_v29 }
  0xef   :  { %v100_v19 = vpop.f32.mrb[0].mxu0 }
  0xf0   :  { %v101_v20 = vadd.f32 %v464_v18, %v100_v19  ;;  %v535_v21 = vpop.f32.mrb[1].mxu0 }
  0xf1   :  { %v103_v22 = vpop.f32.mrb[2].mxu0 }
  0xf2   :  { %v104_v23 = vadd.f32 %v464_v18, %v103_v22  ;;  %v536_v24 = vpop.f32.mrb[3].mxu0  ;;  %v107_v25 = vmax.f32 %v101_v20, 0.0 }
  0xf4   :  { %v108_v26 = vmax.f32 %v104_v23, 0.0 }
  0xf6   :  { %v109_v27 = vpack.c.bf16 %v108_v26, %v107_v25 }
  0xf8   :  { %554 = vmatmul.mubr.bf16.vlgmr.msra.gmra.mrb[0].mxu1 %v109_v27 }
  0xf9   :  { %593 = vmatprep.mubr.msk.bf16.mxu1 %vm657_vm0, %v656_v0  ;;  %578 = vmatpush3.bf16.msra.mxu1 %v621_v30 }
  0xfa   :  { %579 = vmatprep.subr.bf16.mxu1 %v656_v0 }
  0xfd   :  { %580 = vmatpush3.bf16.msra.mxu1 %v622_v31 }
  0xfe   :  { %581 = vmatprep.subr.bf16.mxu1 %v656_v0 }
 0x101   :  { %582 = vmatpush3.bf16.msra.mxu1 %v623_v32 }
 0x102   :  { %583 = vmatprep.subr.bf16.mxu1 %v656_v0 }
 0x105   :  { %584 = vmatpush3.bf16.msra.mxu1 %v624_v33 }
 0x106   :  { %585 = vmatprep.subr.bf16.mxu1 %v656_v0 }
 0x109   :  { %586 = vmatpush3.bf16.msra.mxu1 %v625_v34 }
 0x10a   :  { %587 = vmatprep.subr.bf16.mxu1 %v656_v0 }
 0x10d   :  { %588 = vmatpush3.bf16.msra.mxu1 %v626_v35 }
 0x10e   :  { %589 = vmatprep.subr.bf16.mxu1 %v656_v0 }
 0x111   :  { %590 = vmatpush3.bf16.msra.mxu1 %v627_v46 }
 0x112   :  { %591 = vmatprep.subr.bf16.mxu1 %v656_v0 }
 0x115   :  { %592 = vmatpush3.bf16.msra.mxu1 %v628_v47 }
 0x1cb   :  { %v216_v37 = vpop.f32.mrb[0].mxu1 }
 0x1cc   :  { %v217_v38 = vadd.f32 %v470_v36, %v216_v37  ;;  %v555_v39 = vpop.f32.mrb[1].mxu1 }
 0x1cd   :  { %v219_v40 = vpop.f32.mrb[2].mxu1 }
 0x1ce   :  { %v220_v41 = vadd.f32 %v470_v36, %v219_v40  ;;  %v556_v42 = vpop.f32.mrb[3].mxu1  ;;  %v223_v43 = vmax.f32 %v217_v38, 0.0 }
 0x1d0   :  { %v224_v44 = vmax.f32 %v220_v41, 0.0 }
 0x1d2   :  { %v225_v45 = vpack.c.bf16 %v224_v44, %v223_v43 }
 0x1d4   :  { %574 = vmatmul.mubr.bf16.vlgmr.msra.gmra.mrb[4].mxu0 %v225_v45 }
 0x2a7   :  { %v333_v49 = vpop.f32.mrb[4].mxu0 }
 0x2a8   :  { %v334_v50 = vadd.f32 %v480_v48, %v333_v49  ;;  %v575_v51 = vpop.f32.mrb[5].mxu0 }
 0x2a9   :  { %v336_v52 = vpop.f32.mrb[6].mxu0 }
 0x2aa   :  { %v337_v53 = vadd.f32 %v480_v48, %v336_v52  ;;  %v576_v54 = vpop.f32.mrb[7].mxu0  ;;  %v340_v55 = vmax.f32 %v334_v50, 0.0 }
 0x2ac   :  { %v341_v56 = vmax.f32 %v337_v53, 0.0 }
 0x2ae   :  { %v342_v57 = vpack.c.bf16 %v341_v56, %v340_v55 }
 0x2b0   :  { %594 = vmatmul.mubr.bf16.vlgmr.msra.gmra.mrb[4].mxu1 %v342_v57 }
 0x383   :  { %v450_v59 = vpop.f32.mrb[4].mxu1 }
 0x384   :  { %v451_v60 = vadd.f32 %v490_v58, %v450_v59  ;;  %v595_v61 = vpop.f32.mrb[5].mxu1 }
 0x385   :  { %v453_v62 = vpop.f32.mrb[6].mxu1 }
 0x386   :  { %457 = vst [vmem:[%s760_s4] sm:$0xff] %v451_v60  ;;  %v454_v63 = vadd.f32 %v490_v58, %v453_v62  ;;  %v596_v0 = vpop.f32.mrb[7].mxu1 }
 0x388   :  { %458 = vst [vmem:[%s760_s4 + $0x8] sm:$0xff] %v454_v63 }
 0x389   :  { %463 = vsyncpa [#allocation3], 1 }

</bundles_post_ra>
